<compile_context>
chip_gen: v5e
topology: v5e:2x2
jax: 0.10.0
libtpu: 0.0.40
codegen_flags: <defaults>
</compile_context>

<pallas_src>
import functools
import math

import jax
import jax.numpy as jnp
from jax import lax
from jax.experimental import pallas as pl
from jax.experimental.pallas import tpu as pltpu


_MIN_PALLAS_D = 1024          # below this, XLA fusion beats a pallas launch
_MIN_FILL_LANE_WIDTH = 1024   # keep >= this many lanes per (reshaped) row
_ROW_FILL_TARGET = 512        # sublane-fill target: >= 2 row blocks of <= 64
_LANE_CHUNK = 512             # in-kernel reduction chunk (4 x 128-lane slices)


@functools.lru_cache(maxsize=None)
def _vmem_budgets():
    """(vmem_limit_bytes, double-buffered input working-set budget)."""
    cap = 0
    try:
        cap = int(getattr(pltpu.get_tpu_info(), "vmem_capacity_bytes", 0))
    except Exception:
        cap = 0
    if cap >= 96 * 1024 * 1024:               # v5e / v6e: 128 MiB physical VMEM
        return 64 * 1024 * 1024, 28 * 1024 * 1024
    # v7x (64 MiB physical, 32 MiB scoped default) or unknown generation.
    return 32 * 1024 * 1024, 12 * 1024 * 1024


# --------------------------------------------------------------------------
# Kernels: lane-axis row reductions.  Output block (tr, 128) stays resident
# across the (last, "arbitrary") reduction grid axis; the final 128-lane sum
# happens in JAX.  The lane tail (d % td != 0) is masked in-kernel.
# --------------------------------------------------------------------------
def _sqdiff_rowsum_kernel(x_ref, y_ref, o_ref, *, d_total, chunk, need_mask):
    k = pl.program_id(1)

    @pl.when(k == 0)
    def _():
        o_ref[...] = jnp.zeros_like(o_ref)

    tr, td = x_ref.shape
    col0 = k * td
    lane_ids = (lax.broadcasted_iota(jnp.int32, (tr, 128), 1)
                if need_mask else None)          # hoisted out of the loop

    def body(c, acc):
        for t in range(chunk // 128):
            start = pl.multiple_of(c * chunk + t * 128, 128)
            xs = x_ref[:, pl.ds(start, 128)].astype(jnp.float32)
            ys = y_ref[:, pl.ds(start, 128)].astype(jnp.float32)
            df = xs - ys
            if need_mask:
                df = jnp.where(lane_ids < d_total - (col0 + start), df, 0.0)
            acc = acc + df * df
        return acc

    acc = lax.fori_loop(0, td // chunk, body, jnp.zeros((tr, 128), jnp.float32))
    o_ref[...] += acc


def _log_rowsum_kernel(v_ref, o_ref, *, d_total, chunk, need_mask):
    k = pl.program_id(1)

    @pl.when(k == 0)
    def _():
        o_ref[...] = jnp.zeros_like(o_ref)

    tr, td = v_ref.shape
    col0 = k * td
    lane_ids = (lax.broadcasted_iota(jnp.int32, (tr, 128), 1)
                if need_mask else None)

    def body(c, acc):
        for t in range(chunk // 128):
            start = pl.multiple_of(c * chunk + t * 128, 128)
            v = v_ref[:, pl.ds(start, 128)].astype(jnp.float32)
            if need_mask:
                # Masked-out lanes contribute log(1) = 0 (and never see the
                # unspecified padding of the partial tile).
                v = jnp.where(lane_ids < d_total - (col0 + start), v, 1.0)
            acc = acc + jnp.log(v)
        return acc

    acc = lax.fori_loop(0, td // chunk, body, jnp.zeros((tr, 128), jnp.float32))
    o_ref[...] += acc


# --------------------------------------------------------------------------
# Tiling helpers
# --------------------------------------------------------------------------
def _min_sublanes(dtype):
    itemsize = jnp.dtype(dtype).itemsize
    return max(8, 32 // max(itemsize, 1))   # f32 -> 8, bf16 -> 16, int8 -> 32


def _sublane_fill_factor(rows, d):
    """Power-of-two R for (rows, d) -> (rows*R, d/R): fills sublanes and gives
    the parallel row grid axis extent >= 2, keeping the lane width a multiple
    of 128 (aligned row strides) and reasonably large."""
    r = 1
    while (rows * r * 2 <= _ROW_FILL_TARGET
           and d % (r * 2 * 128) == 0
           and d // (r * 2) >= _MIN_FILL_LANE_WIDTH):
        r *= 2
    return r


def _pick_row_tile(rows, min_rows):
    """Largest row tile <= 64 (bounds accumulator vreg pressure) that is a
    multiple of the sublane packing and yields >= 2 row blocks; otherwise the
    full row extent (single block, full-dim exemption)."""
    if rows % min_rows != 0:
        return rows
    cand = (min(64, rows) // min_rows) * min_rows
    while cand >= min_rows:
        if rows % cand == 0 and rows // cand >= 2:
            return cand
        cand -= min_rows
    return rows


def _pick_lane_tile(d, tr, n_inputs, itemsize, input_budget):
    """Largest multiple of _LANE_CHUNK lanes <= d that fits the double-buffered
    VMEM input budget.  No 'must divide d' constraint (tail is masked)."""
    cap = input_budget // (n_inputs * 2 * tr * itemsize)
    cap = (cap // _LANE_CHUNK) * _LANE_CHUNK
    return min(cap, (d // _LANE_CHUNK) * _LANE_CHUNK)


def _row_reduce_pallas(kernel_fn, inputs_2d, flops_per_elem, trans_per_elem):
    """Row reduction over the lane axis of one or two (rows, D) slabs.
    Returns (rows,) partial sums, or None if the shape does not tile usefully."""
    rows, d = inputs_2d[0].shape
    n_in = len(inputs_2d)
    itemsize = max(jnp.dtype(a.dtype).itemsize for a in inputs_2d)
    min_rows = max(_min_sublanes(a.dtype) for a in inputs_2d)
    vmem_limit, input_budget = _vmem_budgets()

    tr = _pick_row_tile(rows, min_rows)
    td = _pick_lane_tile(d, tr, n_in, itemsize, input_budget)
    if td < _LANE_CHUNK:
        return None                       # fall back to plain JAX

    n_lane_blocks = (d + td - 1) // td
    need_mask = (d % td) != 0
    kernel = functools.partial(kernel_fn, d_total=d, chunk=_LANE_CHUNK,
                               need_mask=need_mask)

    cost = pl.CostEstimate(
        flops=int(flops_per_elem * rows * d),
        transcendentals=int(trans_per_elem * rows * d),
        bytes_accessed=int(n_in * rows * d * itemsize + rows * 128 * 4),
    )

    out = pl.pallas_call(
        kernel,
        out_shape=jax.ShapeDtypeStruct((rows, 128), jnp.float32),
        grid_spec=pltpu.PrefetchScalarGridSpec(
            num_scalar_prefetch=0,
            grid=(rows // tr, n_lane_blocks),
            in_specs=[pl.BlockSpec((tr, td), lambda i, k: (i, k))] * n_in,
            out_specs=pl.BlockSpec((tr, 128), lambda i, k: (i, 0)),
        ),
        compiler_params=pltpu.CompilerParams(
            dimension_semantics=("parallel", "arbitrary"),
            vmem_limit_bytes=vmem_limit,
        ),
        cost_estimate=cost,
    )(*inputs_2d)
    # Final cross-lane reduce of a tiny (rows, 128) array stays in JAX.
    return jnp.sum(out, axis=-1)


# --------------------------------------------------------------------------
# Per-sample reductions
# --------------------------------------------------------------------------
def per_sample_sqerr_sum(x2d, y2d):
    """(rows, D), (rows, D) -> (rows,) sum of squared differences."""
    rows, d = x2d.shape
    if d >= _MIN_PALLAS_D:
        r = _sublane_fill_factor(rows, d)
        xr = x2d.reshape(rows * r, d // r)
        yr = y2d.reshape(rows * r, d // r)
        part = _row_reduce_pallas(_sqdiff_rowsum_kernel, [xr, yr], 3, 0)
        if part is not None:
            return jnp.sum(part.reshape(rows, r), axis=1)
    xf = x2d.astype(jnp.float32)
    yf = y2d.astype(jnp.float32)
    return jnp.sum((xf - yf) ** 2, axis=1)


def per_sample_log_sum(v2d):
    """(rows, D) -> (rows,) sum of log(v) over D."""
    rows, d = v2d.shape
    if d >= _MIN_PALLAS_D:
        r = _sublane_fill_factor(rows, d)
        vr = v2d.reshape(rows * r, d // r)
        part = _row_reduce_pallas(_log_rowsum_kernel, [vr], 1, 1)
        if part is not None:
            return jnp.sum(part.reshape(rows, r), axis=1)
    return jnp.sum(jnp.log(v2d.astype(jnp.float32)), axis=1)


# --------------------------------------------------------------------------
# RateDistortionLoss forward (JAX glue around the Pallas reductions)
# --------------------------------------------------------------------------
def rate_distortion_loss(output, target, lmbda=0.01, bitdepth=8):
    """Mirrors RateDistortionLoss.forward (return_details=False)."""
    x_hat_list = output["x_hat"]
    likelihoods_list = output["likelihoods"]

    assert len(x_hat_list) == len(target)
    _, _, H, W = target[0].shape
    num_frames = len(target)
    num_pixels = H * W * num_frames
    scale = float((2 ** bitdepth - 1) ** 2)
    n_batch = int(target[0].shape[0])

    # --- distortion: one kernel call per frame (no stacked slab copies) ----
    distortions = []
    for xh, x in zip(x_hat_list, target):
        if xh.shape[1] != x.shape[1]:
            raise RuntimeError(
                "number of channels mismatches while computing distortion")
        n = int(x.shape[0])
        d = int(x.shape[1] * x.shape[2] * x.shape[3])
        sq = per_sample_sqerr_sum(xh.reshape(n, d), x.reshape(n, d))
        distortions.append(sq / float(d))           # per-sample MSE over C,H,W

    out = {}
    out["mse_loss"] = jnp.mean(jnp.stack(distortions))
    scaled_distortions = sum(distortions) * (scale / num_frames)   # (N,)

    # --- bpp: one kernel call per likelihood field (no stacking) -----------
    # TODO(synk): like the PyTorch reference, log() has no lower clamp; a zero
    # likelihood yields -inf in bpp_loss.
    neg_inv = 1.0 / (-math.log(2) * num_pixels)
    bpp_loss = jnp.zeros((n_batch,), jnp.float32)
    for frame_likelihoods in likelihoods_list:
        for _label, fields in frame_likelihoods.items():
            for _field, v in fields.items():
                assert int(v.shape[0]) == n_batch, "likelihood batch mismatch"
                n = int(v.shape[0])
                d = int(v.shape[1] * v.shape[2] * v.shape[3])
                if d >= _MIN_PALLAS_D:
                    s = per_sample_log_sum(v.reshape(n, d))
                else:
                    # Tiny fields: plain XLA fusion beats a pallas launch.
                    s = jnp.sum(jnp.log(v.astype(jnp.float32)), axis=(1, 2, 3))
                bpp_loss = bpp_loss + s * neg_inv

    lambdas = jnp.full_like(bpp_loss, lmbda)
    bpp_loss_mean = jnp.mean(bpp_loss)
    out["loss"] = jnp.mean(lambdas * scaled_distortions) + bpp_loss_mean
    out["distortion"] = jnp.mean(scaled_distortions)
    out["bpp_loss"] = bpp_loss_mean
    return out


# --------------------------------------------------------------------------
# Pure-JAX reference (for correctness checking only)
# --------------------------------------------------------------------------
def _reference_loss(output, target, lmbda=0.01, bitdepth=8):
    _, _, H, W = target[0].shape
    num_frames = len(target)
    num_pixels = H * W * num_frames
    scale = float((2 ** bitdepth - 1) ** 2)
    distortions = []
    for xh, x in zip(output["x_hat"], target):
        diff = xh.astype(jnp.float32) - x.astype(jnp.float32)
        distortions.append(jnp.mean(diff * diff, axis=(1, 2, 3)))
    mse_loss = jnp.mean(jnp.stack(distortions))
    scaled = sum(distortions) * (scale / num_frames)
    bpp = jnp.zeros((target[0].shape[0],), jnp.float32)
    for fl in output["likelihoods"]:
        for _lab, fields in fl.items():
            for _f, v in fields.items():
                bpp = bpp + jnp.sum(jnp.log(v.astype(jnp.float32)),
                                    axis=(1, 2, 3)) / (-math.log(2) * num_pixels)
    bpp_mean = jnp.mean(bpp)
    return {
        "loss": jnp.mean(lmbda * scaled) + bpp_mean,
        "mse_loss": mse_loss,
        "bpp_loss": bpp_mean,
        "distortion": jnp.mean(scaled),
    }


# --------------------------------------------------------------------------
# Example / smoke test
# --------------------------------------------------------------------------
if __name__ == "__main__":
    key = jax.random.PRNGKey(0)
    # Frames: D = 3*18*30 = 1620 -> Pallas sqdiff path with masked lane tail.
    num_frames, N, C, H, W = 2, 2, 3, 18, 30

    keys = jax.random.split(key, 10)
    target = [
        jax.random.uniform(keys[i], (N, C, H, W), dtype=jnp.float32)
        for i in range(num_frames)
    ]
    x_hat = [
        jnp.clip(
            target[i]
            + 0.05 * jax.random.normal(keys[2 + i], (N, C, H, W), jnp.float32),
            0.0,
            1.0,
        )
        for i in range(num_frames)
    ]
    # Likelihoods in (0, 1]:
    #   'y' (D=2048)  -> Pallas log kernel with sublane-fill (rows 2 -> 4).
    #   'w' (D=1500)  -> Pallas log kernel with masked lane tail.
    #   'z' (D=64)    -> plain-JAX fallback.
    likelihoods = [
        {
            "keyframe": {
                "y": jax.random.uniform(
                    keys[4 + i], (N, 8, 16, 16), jnp.float32, 0.1, 1.0
                ),
                "w": jax.random.uniform(
                    keys[6 + i], (N, 5, 10, 30), jnp.float32, 0.1, 1.0
                ),
                "z": jax.random.uniform(
                    keys[8 + i], (N, 4, 4, 4), jnp.float32, 0.1, 1.0
                ),
            }
        }
        for i in range(num_frames)
    ]

    output = {"x_hat": x_hat, "likelihoods": likelihoods}
    out = rate_distortion_loss(output, target, lmbda=0.01, bitdepth=8)
    out = jax.tree_util.tree_map(jax.block_until_ready, out)

    ref = _reference_loss(output, target, lmbda=0.01, bitdepth=8)
    for k_ in ("loss", "mse_loss", "bpp_loss", "distortion"):
        assert bool(jnp.isfinite(out[k_])), f"non-finite value for {k_}"
        assert bool(
            jnp.allclose(out[k_], ref[k_], rtol=2e-5, atol=1e-6)
        ), f"mismatch for {k_}: {out[k_]} vs {ref[k_]}"

    print("KERNEL_OK")
</pallas_src>

<mosaic_0001>
module attributes {stable_mosaic.version = 11 : i64} {
  func.func @_sqdiff_rowsum_kernel(%arg0: i32, %arg1: i32, %arg2: memref<2x1536xf32, #tpu.memory_space<vmem>>, %arg3: memref<2x1536xf32, #tpu.memory_space<vmem>>, %arg4: memref<2x128xf32, #tpu.memory_space<vmem>>) attributes {dimension_semantics = [#tpu.dimension_semantics<parallel>, #tpu.dimension_semantics<arbitrary>], iteration_bounds = array<i64: 1, 2>, scalar_prefetch = 0 : i64, scratch_operands = 0 : i64, tpu.core_type = #tpu.core_type<tc>, window_params = [{transform_indices = @transform_0, window_bounds = array<i64: 2, 1536>}, {transform_indices = @transform_1, window_bounds = array<i64: 2, 1536>}, {transform_indices = @transform_2, window_bounds = array<i64: 2, 128>}]} {
    %c0_i32 = arith.constant 0 : i32
    %0 = arith.cmpi eq, %arg1, %c0_i32 : i32
    %1 = arith.extui %0 : i1 to i32
    %c0_i32_0 = arith.constant 0 : i32
    %2 = arith.cmpi ne, %1, %c0_i32_0 : i32
    scf.if %2 {
      %cst_6 = arith.constant 0.000000e+00 : f32
      %11 = vector.broadcast %cst_6 : f32 to vector<2x128xf32>
      %c0_7 = arith.constant 0 : index
      %c0_8 = arith.constant 0 : index
      %12 = vector.load %arg4[%c0_7, %c0_8] : memref<2x128xf32, #tpu.memory_space<vmem>>, vector<2x128xf32>
      tpu.vector_store %arg4[%c0_7, %c0_8], %11 {strides = array<i32>} : memref<2x128xf32, #tpu.memory_space<vmem>>, vector<2x128xf32>,
    } else {
    }
    %c1536_i32 = arith.constant 1536 : i32
    %3 = arith.muli %arg1, %c1536_i32 : i32
    %4 = tpu.iota {dimensions = array<i32: 1>} : vector<2x128xi32>
    %cst = arith.constant 0.000000e+00 : f32
    %5 = vector.broadcast %cst : f32 to vector<2x128xf32>
    %c0_i32_1 = arith.constant 0 : i32
    %c3_i32 = arith.constant 3 : i32
    %6 = arith.addi %c0_i32_1, %c3_i32 : i32
    %c1_i32 = arith.constant 1 : i32
    %7 = scf.for %arg5 = %c0_i32_1 to %6 step %c1_i32 iter_args(%arg6 = %5) -> (vector<2x128xf32>)  : i32 {
      %c512_i32 = arith.constant 512 : i32
      %11 = arith.muli %arg5, %c512_i32 : i32
      %c0_i32_6 = arith.constant 0 : i32
      %12 = arith.addi %11, %c0_i32_6 : i32
      %13 = tpu.assume_multiple %12, 128 : i32
      %c0_7 = arith.constant 0 : index
      %14 = arith.index_cast %13 : i32 to index
      %15 = vector.load %arg2[%c0_7, %14] : memref<2x1536xf32, #tpu.memory_space<vmem>>, vector<2x128xf32>
      %c0_8 = arith.constant 0 : index
      %16 = arith.index_cast %13 : i32 to index
      %17 = vector.load %arg3[%c0_8, %16] : memref<2x1536xf32, #tpu.memory_space<vmem>>, vector<2x128xf32>
      %18 = arith.subf %15, %17 : vector<2x128xf32>
      %19 = arith.addi %3, %13 : i32
      %c1620_i32 = arith.constant 1620 : i32
      %20 = arith.subi %c1620_i32, %19 : i32
      %21 = vector.broadcast %20 : i32 to vector<2x128xi32>
      %22 = arith.cmpi slt, %4, %21 : vector<2x128xi32>
      %cst_9 = arith.constant 0.000000e+00 : f32
      %23 = vector.broadcast %cst_9 : f32 to vector<2x128xf32>
      %24 = arith.select %22, %18, %23 : vector<2x128xi1>, vector<2x128xf32>
      %25 = arith.mulf %24, %24 : vector<2x128xf32>
      %26 = arith.addf %arg6, %25 : vector<2x128xf32>
      %c512_i32_10 = arith.constant 512 : i32
      %27 = arith.muli %arg5, %c512_i32_10 : i32
      %c128_i32 = arith.constant 128 : i32
      %28 = arith.addi %27, %c128_i32 : i32
      %29 = tpu.assume_multiple %28, 128 : i32
      %c0_11 = arith.constant 0 : index
      %30 = arith.index_cast %29 : i32 to index
      %31 = vector.load %arg2[%c0_11, %30] : memref<2x1536xf32, #tpu.memory_space<vmem>>, vector<2x128xf32>
      %c0_12 = arith.constant 0 : index
      %32 = arith.index_cast %29 : i32 to index
      %33 = vector.load %arg3[%c0_12, %32] : memref<2x1536xf32, #tpu.memory_space<vmem>>, vector<2x128xf32>
      %34 = arith.subf %31, %33 : vector<2x128xf32>
      %35 = arith.addi %3, %29 : i32
      %c1620_i32_13 = arith.constant 1620 : i32
      %36 = arith.subi %c1620_i32_13, %35 : i32
      %37 = vector.broadcast %36 : i32 to vector<2x128xi32>
      %38 = arith.cmpi slt, %4, %37 : vector<2x128xi32>
      %cst_14 = arith.constant 0.000000e+00 : f32
      %39 = vector.broadcast %cst_14 : f32 to vector<2x128xf32>
      %40 = arith.select %38, %34, %39 : vector<2x128xi1>, vector<2x128xf32>
      %41 = arith.mulf %40, %40 : vector<2x128xf32>
      %42 = arith.addf %26, %41 : vector<2x128xf32>
      %c512_i32_15 = arith.constant 512 : i32
      %43 = arith.muli %arg5, %c512_i32_15 : i32
      %c256_i32 = arith.constant 256 : i32
      %44 = arith.addi %43, %c256_i32 : i32
      %45 = tpu.assume_multiple %44, 128 : i32
      %c0_16 = arith.constant 0 : index
      %46 = arith.index_cast %45 : i32 to index
      %47 = vector.load %arg2[%c0_16, %46] : memref<2x1536xf32, #tpu.memory_space<vmem>>, vector<2x128xf32>
      %c0_17 = arith.constant 0 : index
      %48 = arith.index_cast %45 : i32 to index
      %49 = vector.load %arg3[%c0_17, %48] : memref<2x1536xf32, #tpu.memory_space<vmem>>, vector<2x128xf32>
      %50 = arith.subf %47, %49 : vector<2x128xf32>
      %51 = arith.addi %3, %45 : i32
      %c1620_i32_18 = arith.constant 1620 : i32
      %52 = arith.subi %c1620_i32_18, %51 : i32
      %53 = vector.broadcast %52 : i32 to vector<2x128xi32>
      %54 = arith.cmpi slt, %4, %53 : vector<2x128xi32>
      %cst_19 = arith.constant 0.000000e+00 : f32
      %55 = vector.broadcast %cst_19 : f32 to vector<2x128xf32>
      %56 = arith.select %54, %50, %55 : vector<2x128xi1>, vector<2x128xf32>
      %57 = arith.mulf %56, %56 : vector<2x128xf32>
      %58 = arith.addf %42, %57 : vector<2x128xf32>
      %c512_i32_20 = arith.constant 512 : i32
      %59 = arith.muli %arg5, %c512_i32_20 : i32
      %c384_i32 = arith.constant 384 : i32
      %60 = arith.addi %59, %c384_i32 : i32
      %61 = tpu.assume_multiple %60, 128 : i32
      %c0_21 = arith.constant 0 : index
      %62 = arith.index_cast %61 : i32 to index
      %63 = vector.load %arg2[%c0_21, %62] : memref<2x1536xf32, #tpu.memory_space<vmem>>, vector<2x128xf32>
      %c0_22 = arith.constant 0 : index
      %64 = arith.index_cast %61 : i32 to index
      %65 = vector.load %arg3[%c0_22, %64] : memref<2x1536xf32, #tpu.memory_space<vmem>>, vector<2x128xf32>
      %66 = arith.subf %63, %65 : vector<2x128xf32>
      %67 = arith.addi %3, %61 : i32
      %c1620_i32_23 = arith.constant 1620 : i32
      %68 = arith.subi %c1620_i32_23, %67 : i32
      %69 = vector.broadcast %68 : i32 to vector<2x128xi32>
      %70 = arith.cmpi slt, %4, %69 : vector<2x128xi32>
      %cst_24 = arith.constant 0.000000e+00 : f32
      %71 = vector.broadcast %cst_24 : f32 to vector<2x128xf32>
      %72 = arith.select %70, %66, %71 : vector<2x128xi1>, vector<2x128xf32>
      %73 = arith.mulf %72, %72 : vector<2x128xf32>
      %74 = arith.addf %58, %73 : vector<2x128xf32>
      scf.yield %74 : vector<2x128xf32>
    }
    %c3_i32_2 = arith.constant 3 : i32
    %c0 = arith.constant 0 : index
    %c0_3 = arith.constant 0 : index
    %8 = vector.load %arg4[%c0, %c0_3] : memref<2x128xf32, #tpu.memory_space<vmem>>, vector<2x128xf32>
    %9 = arith.addf %8, %7 : vector<2x128xf32>
    %c0_4 = arith.constant 0 : index
    %c0_5 = arith.constant 0 : index
    %10 = vector.load %arg4[%c0_4, %c0_5] : memref<2x128xf32, #tpu.memory_space<vmem>>, vector<2x128xf32>
    tpu.vector_store %arg4[%c0_4, %c0_5], %9 {strides = array<i32>} : memref<2x128xf32, #tpu.memory_space<vmem>>, vector<2x128xf32>,
    return
  }
  func.func @transform_0(%arg0: i32, %arg1: i32) -> (i32, i32) {
    %c0_i32 = arith.constant 0 : i32
    return %arg0, %arg1 : i32, i32
  }
  func.func @transform_1(%arg0: i32, %arg1: i32) -> (i32, i32) {
    %c0_i32 = arith.constant 0 : i32
    return %arg0, %arg1 : i32, i32
  }
  func.func @transform_2(%arg0: i32, %arg1: i32) -> (i32, i32) {
    %c0_i32 = arith.constant 0 : i32
    %c0_i32_0 = arith.constant 0 : i32
    return %arg0, %c0_i32 : i32, i32
  }
}

</mosaic_0001>

<bundles_post_ra>
// kernel: tpu_custom_call.1
= control target key start
LH: loop header
LB: loop body
LE: loop exit
PB: predicated region body
PF: predicated region fallthrough
CT: control target
= control target key end

     0   :  { %7 = vsyncpa [#allocation3], 0  ;;  %s964_s0 = inlined_call_operand.hbm [shape: f32[2,1620], index: 0, kind: input, shape index: {}]   ;;  %s965_s1 = inlined_call_operand.hbm [shape: f32[2,1620], index: 1, kind: input, shape index: {}]   ;;  %s966_s2 = inlined_call_operand.hbm [shape: f32[2,128], index: 2, kind: output, shape index: {}]  }
   0x1   :  { %9 = vsyncpa [#allocation3 + $0x1], 0 }
   0x2   :  { %10 = vsyncpa [#allocation6], 0 }
   0x3   :  { %12 = vsyncpa [#allocation6 + $0x1], 0 }
   0x4   :  { %13 = vsyncpa [#allocation4], 0  ;;  %s758_s9 = smov 0   ;;  %s760_s10 = smov 0  }
   0x5   :  { %s762_s11 = smov 0   ;;  %s764_s12 = smov 0  }
   0x6   :  { %s766_s13 = smov 0   ;;  %s768_s14 = smov 0  }
   0x7 LB: > { %s450_s15 = sadd.s32 4294967295, %s729_s14   ;;  %s28_s16 = sadd.s32 1, %s725_s13  ;;  %s729_s14 = sphi %s768_s14, %s19_s14   ;;  %s725_s13 = sphi %s766_s13, %s976_s13   ;;  %s721_s12 = sphi %s764_s12, %s975_s12   ;;  %s717_s11 = sphi %s762_s11, %s974_s11   ;;  %s713_s10 = sphi %s760_s10, %s973_s10   ;;  %s709_s9 = sphi %s758_s9, %s972_s9  }
   0x8   : > { %p29_p0 = scmp.ge.s32.totalorder %s28_s16, 2  ;;  %s40_s17 = sadd.s32 1, %s717_s11 }
   0x9   : > { %p47_p1 = scmp.ne.s32.totalorder %s717_s11, %s713_s10  ;;  %p48_p2 = scmp.eq.s32.totalorder %s729_s14, 0 }
   0xa   : > { %s978_s16 = smov (%p29_p0, %s28_s16), 0  ;;  %p53_p4 = scmp.ne.s32.totalorder %s713_s10, %s709_s9 }
   0xb   : > { %p794_p3 = por %p48_p2, %p47_p1  ;;  %s36_s19 = ssub.s32 %s725_s13, %s978_s16 }
   0xc   : > { %p54_p5 = scmp.eq.s32.totalorder %s450_s15, 0  ;;  %p38_p6 = scmp.eq.s32.totalorder %s36_s19, 0 }
   0xd   : > { %p452_p8 = scmp.ge.s32.totalorder %s729_s14, 2 }
   0xe   : > { %p803_p7 = por %p54_p5, %p53_p4 }
   0xf   : > { %s808_s21 = scalar_select %p38_p6, %s717_s11, %s40_s17  }
  0x10   : > { %127 = sbr.rel (%p452_p8) target bundleno = 95 (0x5f), region = 16 }
  0x15   : > { %130 = sbr.rel (!%p794_p3) target bundleno = 58 (0x3a), region = 20  ;;  %s131_s22 = sand.u32 (%p794_p3), 1, %s717_s11  }
  0x16   : > { %s136_s23 = smul.u32 (%p794_p3), 12, %s725_s13  ;;  %s818_s29 = scalar_lea.sflag (%p794_p3), [#allocation3], %s131_s22 }
  0x17   : > { %s480_s24 = smul.u32 (%p794_p3), 24, %s131_s22 }
  0x18   : > { %s137_s25 = ssub.s32 (%p794_p3), 13, %s136_s23 }
  0x19   : > { %p138_p9 = scmp.lt.s32.totalorder (%p794_p3), %s137_s25, 12  ;;  %s135_s30 = scalar_lea.vmem (%p794_p3), [#allocation2], %s480_s24 }
  0x1b   : > { %s980_s25 = smov (!%p138_p9, %s137_s25), 12 }
  0x1c   : > { %s453_s26 = sshll.u32 %s980_s25, 1 }
  0x1d   : > { %s141_s27 = ssub.s32 24, %s453_s26 }
  0x1e   : > { %s142_s28 = sshll.u32 %s141_s27, 4 }
  0x1f   : > { %143 = vsyncadd %s818_s29, %s142_s28  ;;  %p821_p10 = scmp.ne.s32.totalorder %s453_s26, 0  ;;  %s478_s4 = smul.u32 24, %s725_s13 }
  0x20   : > { %s457_s5 = sshll.u32 %s980_s25, 5  ;;  %s827_s6 = sshll.u32 %s135_s30, 4  ;;  %s154_s6 = int_to_ptr.vmem [resolvable:$true] %s827_s6 }
  0x21   : > { %s148_s9 = scalar_lea.hbm %s964_s0, %s478_s4  ;;  %s559_s22 = sshrl.u32 %s457_s5, 4 }
  0x22   : > { %s151_s17 = sshll.u32 %s148_s9, 4  ;;  %s568_s27 = scalar_lea.hbm %s964_s0, 26  ;;  %s152_s17 = int_to_ptr.hbm [resolvable:$true] %s151_s17 }
  0x23   : > { %s557_s19 = sshra.s32 %s152_s17, 4  ;;  %s558_s19 = int_to_ptr.hbm [resolvable:$true] %s557_s19 }
  0x24   : > { %s564_s23 = scalar_lea.hbm %s558_s19, %s559_s22 }
  0x25   : > { %p565_p11 = scmp.ne.s32.totalorder %s558_s19, %s564_s23  ;;  %p570_p0 = scmp.lt.s32.totalorder %s568_s27, %s564_s23 }
  0x27   : > { %p566_p12 = pnand %p565_p11, %p821_p10 }
  0x29   : > { %p567_p13 = pneg %p566_p12 }
  0x2b   : > { %p572_p1 = pnand %p570_p0, %p567_p13 }
  0x2d   : > { %575 = shalt.err (!%p572_p1)
}
  0x2e   : > { %s576_s28 = sshra.s32 %s154_s6, 4  ;;  %s739_s4 = smov [#allocation2]   ;;  %s577_s28 = int_to_ptr.vmem [resolvable:$true] %s576_s28 }
  0x2f   : > { %s583_s30 = scalar_lea.vmem %s577_s28, %s559_s22  ;;  %s587_s7 = scalar_lea.vmem %s739_s4, 48 }
  0x30   : > { %p584_p2 = scmp.ne.s32.totalorder %s577_s28, %s583_s30  ;;  %p589_p6 = scmp.lt.s32.totalorder %s587_s7, %s583_s30 }
  0x32   : > { %p585_p4 = pnand %p584_p2, %p821_p10 }
  0x34   : > { %p586_p5 = pneg %p585_p4 }
  0x36   : > { %p591_p8 = pnand %p589_p6, %p586_p5 }
  0x38   : > { %594 = shalt.err (!%p591_p8)
}
  0x39   : > { %156 = dma.hbm_to_vmem [thread:$0]  (%p821_p10), %s152_s17, %s457_s5, %s154_s6, %s818_s29  }
  0x3a PF: > { %159 = sbr.rel (!%p794_p3) target bundleno = 95 (0x5f), region = 24  ;;  %s160_s8 = sand.u32 (%p794_p3), 1, %s717_s11  }
  0x3b   : > { %s165_s9 = smul.u32 (%p794_p3), 12, %s725_s13  ;;  %s854_s26 = scalar_lea.sflag (%p794_p3), [#allocation6], %s160_s8 }
  0x3c   : > { %s481_s19 = smul.u32 (%p794_p3), 24, %s160_s8 }
  0x3d   : > { %s166_s22 = ssub.s32 (%p794_p3), 13, %s165_s9 }
  0x3e   : > { %p167_p9 = scmp.lt.s32.totalorder (%p794_p3), %s166_s22, 12  ;;  %s164_s25 = scalar_lea.vmem (%p794_p3), [#allocation5], %s481_s19 }
  0x40   : > { %s982_s22 = smov (!%p167_p9, %s166_s22), 12 }
  0x41   : > { %s458_s23 = sshll.u32 %s982_s22, 1 }
  0x42   : > { %s170_s3 = ssub.s32 24, %s458_s23 }
  0x43   : > { %s171_s24 = sshll.u32 %s170_s3, 4 }
  0x44   : > { %172 = vsyncadd %s854_s26, %s171_s24  ;;  %p857_p3 = scmp.ne.s32.totalorder %s458_s23, 0  ;;  %s479_s29 = smul.u32 24, %s725_s13 }
  0x45   : > { %s462_s5 = sshll.u32 %s982_s22, 5  ;;  %s863_s6 = sshll.u32 %s164_s25, 4  ;;  %s183_s6 = int_to_ptr.vmem [resolvable:$true] %s863_s6 }
  0x46   : > { %s177_s28 = scalar_lea.hbm %s965_s1, %s479_s29  ;;  %s598_s7 = sshrl.u32 %s462_s5, 4 }
  0x47   : > { %s180_s30 = sshll.u32 %s177_s28, 4  ;;  %s607_s23 = scalar_lea.hbm %s965_s1, 26  ;;  %s181_s30 = int_to_ptr.hbm [resolvable:$true] %s180_s30 }
  0x48   : > { %s596_s4 = sshra.s32 %s181_s30, 4  ;;  %s597_s4 = int_to_ptr.hbm [resolvable:$true] %s596_s4 }
  0x49   : > { %s603_s8 = scalar_lea.hbm %s597_s4, %s598_s7 }
  0x4a   : > { %p604_p10 = scmp.ne.s32.totalorder %s597_s4, %s603_s8  ;;  %p609_p13 = scmp.lt.s32.totalorder %s607_s23, %s603_s8 }
  0x4c   : > { %p605_p11 = pnand %p604_p10, %p857_p3 }
  0x4e   : > { %p606_p12 = pneg %p605_p11 }
  0x50   : > { %p611_p0 = pnand %p609_p13, %p606_p12 }
  0x52   : > { %614 = shalt.err (!%p611_p0)
}
  0x53   : > { %s615_s3 = sshra.s32 %s183_s6, 4  ;;  %s740_s25 = smov [#allocation5]   ;;  %s616_s3 = int_to_ptr.vmem [resolvable:$true] %s615_s3 }
  0x54   : > { %s622_s24 = scalar_lea.vmem %s616_s3, %s598_s7  ;;  %s626_s29 = scalar_lea.vmem %s740_s25, 48 }
  0x55   : > { %p623_p1 = scmp.ne.s32.totalorder %s616_s3, %s622_s24  ;;  %p628_p5 = scmp.lt.s32.totalorder %s626_s29, %s622_s24 }
  0x57   : > { %p624_p2 = pnand %p623_p1, %p857_p3 }
  0x59   : > { %p625_p4 = pneg %p624_p2 }
  0x5b   : > { %p630_p6 = pnand %p628_p5, %p625_p4 }
  0x5d   : > { %633 = shalt.err (!%p630_p6)
}
  0x5e   : > { %185 = dma.hbm_to_vmem [thread:$0]  (%p857_p3), %s181_s30, %s462_s5, %s183_s6, %s854_s26  }
  0x5f PF: > { %p463_p8 = scmp.ge.s32.totalorder %s729_s14, 1  ;;  %p187_p9 = scmp.lt.s32.totalorder %s729_s14, 3 }
  0x61   : > { %p188_p10 = pnand %p463_p8, %p187_p9 }
  0x62   : > { %s193_s17 = sand.u32 (!%p188_p10), 1, %s713_s10  }
  0x63   : > { %191 = sbr.rel (%p188_p10) target bundleno = 149 (0x95), region = 28  ;;  %s194_s28 = scalar_lea.sflag (!%p188_p10), [#allocation3], %s193_s17 }
  0x64   : > { %s482_s27 = smul.u32 (!%p188_p10), 24, %s193_s17 }
  0x66   : > { %s886_s4 = scalar_lea.vmem (!%p188_p10), [#allocation2], %s482_s27 }
  0x68   : > { %696 = dma.done.wait (%p803_p7), %s194_s28, 384  }
  0x69   : > { %698 = vsyncadd (%p803_p7), %s194_s28, 4294966912  ;;  %s204_s22 = scalar_lea.sflag [#allocation6], %s193_s17  ;;  %s892_s26 = scalar_lea.vmem [#allocation5], %s482_s27 }
  0x6a   : > { %700 = dma.done.wait (%p803_p7), %s204_s22, 384  }
  0x6b   : > { %702 = vsyncadd (%p803_p7), %s204_s22, 4294966912  ;;  %p464_p3 = scmp.ne.s32.totalorder %s721_s12, 0 }
  0x6d   : > { %242 = sbr.rel (%p464_p3) target bundleno = 116 (0x74), region = 40 }
  0x72   : > { %v741_v0 = vmov 0.0  }
  0x73   : > { %243 = vst [vmem:[#allocation7] sm:$0x3] %v741_v0 }
  0x74 PF: > { %s900_s18 = smul.u32 1536, %s721_s12  ;;  %v245_v1 = vlaneseq  ;;  %v904_v3 = vmov 0.0   ;;  %s906_s5 = smov 0  }
  0x76   : > { %v902_v2 = vand.u32 127, %v245_v1 }
  0x77 LB: >> { %s913_s12 = sshll.u32 %s737_s5, 9  ;;  %s252_s5 = sadd.s32 1, %s737_s5   ;;  %s737_s5 = sphi %s906_s5, %s252_s5   ;;  %v733_v3 = vphi %v904_v3, %v971_v3  }
  0x78   : >> { %s255_s20 = sshra.s32 %s913_s12, 7  ;;  %s264_s6 = sadd.s32 %s913_s12, %s900_s18 }
  0x79   : >> { %s466_s30 = sshll.u32 %s255_s20, 1  ;;  %s265_s7 = ssub.s32 1620, %s264_s6 }
  0x7a   : >> { %s258_s8 = scalar_lea.vmem %s886_s4, %s466_s30 [#allocation2]  ;;  %s261_s9 = scalar_lea.vmem %s892_s26, %s466_s30 [#allocation5]  ;;  %v266_v4 = vstv %s265_s7 }
  0x7b   : >> { %v259_v5 = vld [vmem:[%s258_s8] sm:$0x3]  ;;  %vm267_vm0 = vcmp.lt.s32.totalorder %v902_v2, %v266_v4  ;;  %s271_s19 = sadd.s32 128, %s913_s12  ;;  %s288_s23 = sadd.s32 256, %s913_s12 }
  0x7c   : >> { %v262_v6 = vld [vmem:[%s261_s9] sm:$0x3]  ;;  %s272_s3 = sshra.s32 %s271_s19, 7  ;;  %s281_s24 = sadd.s32 %s271_s19, %s900_s18 }
  0x7d   : >> { %v263_v7 = vsub.f32 %v259_v5, %v262_v6  ;;  %s468_s25 = sshll.u32 %s272_s3, 1  ;;  %s282_s29 = ssub.s32 1620, %s281_s24 }
  0x7e   : >> { %s275_s17 = scalar_lea.vmem %s886_s4, %s468_s25 [#allocation2]  ;;  %s278_s27 = scalar_lea.vmem %s892_s26, %s468_s25 [#allocation5]  ;;  %v283_v9 = vstv %s282_s29 }
  0x7f   : >> { %v268_v8 = vsel %vm267_vm0, %v263_v7, 0.0  ;;  %v276_v11 = vld [vmem:[%s275_s17] sm:$0x3]  ;;  %vm284_vm1 = vcmp.lt.s32.totalorder %v902_v2, %v283_v9  ;;  %s289_s28 = sshra.s32 %s288_s23, 7  ;;  %s298_s22 = sadd.s32 %s288_s23, %s900_s18 }
  0x80   : >> { %v269_v10 = vmul.f32 %v268_v8, %v268_v8  ;;  %v279_v12 = vld [vmem:[%s278_s27] sm:$0x3]  ;;  %s470_s20 = sshll.u32 %s289_s28, 1  ;;  %s299_s6 = ssub.s32 1620, %s298_s22 }
  0x81   : >> { %v280_v13 = vsub.f32 %v276_v11, %v279_v12  ;;  %s292_s30 = scalar_lea.vmem %s886_s4, %s470_s20 [#allocation2]  ;;  %s295_s7 = scalar_lea.vmem %s892_s26, %s470_s20 [#allocation5]  ;;  %v300_v15 = vstv %s299_s6 }
  0x82   : >> { %v270_v14 = vadd.f32 %v733_v3, %v269_v10  ;;  %v293_v17 = vld [vmem:[%s292_s30] sm:$0x3]  ;;  %vm301_vm2 = vcmp.lt.s32.totalorder %v902_v2, %v300_v15  ;;  %s305_s8 = sadd.s32 384, %s913_s12  ;;  %p249_p7 = scmp.ge.s32.totalorder %s252_s5, 3  }
  0x83   : >> { %v285_v16 = vsel %vm284_vm1, %v280_v13, 0.0  ;;  %v296_v18 = vld [vmem:[%s295_s7] sm:$0x3]  ;;  %s306_s9 = sshra.s32 %s305_s8, 7  ;;  %s315_s19 = sadd.s32 %s305_s8, %s900_s18 }
  0x84   : >> { %v286_v19 = vmul.f32 %v285_v16, %v285_v16  ;;  %v297_v20 = vsub.f32 %v293_v17, %v296_v18  ;;  %s472_s23 = sshll.u32 %s306_s9, 1  ;;  %s316_s3 = ssub.s32 1620, %s315_s19  ;;  %v322_v32 = vld [vmem:[#allocation7] sm:$0x3] (%p249_p7) }
  0x85   : >> { %s309_s24 = scalar_lea.vmem %s886_s4, %s472_s23 [#allocation2]  ;;  %s312_s25 = scalar_lea.vmem %s892_s26, %s472_s23 [#allocation5]  ;;  %v317_v23 = vstv %s316_s3 }
  0x86   : >> { %v287_v21 = vadd.f32 %v286_v19, %v270_v14  ;;  %v302_v22 = vsel %vm301_vm2, %v297_v20, 0.0  ;;  %v310_v25 = vld [vmem:[%s309_s24] sm:$0x3]  ;;  %vm318_vm3 = vcmp.lt.s32.totalorder %v902_v2, %v317_v23  ;;  %p489_p11 = scmp.eq.s32.totalorder (%p249_p7), %s450_s15, 1  ;;  %s335_s17 = sshll.u32 (%p249_p7), %s966_s2, 4  ;;  %s336_s17 = int_to_ptr.hbm [resolvable:$true] %s335_s17 }
  0x87   : >> { %v303_v24 = vmul.f32 %v302_v22, %v302_v22  ;;  %v313_v26 = vld [vmem:[%s312_s25] sm:$0x3]  ;;  %s742_s27 = smov (%p249_p7), [#allocation7]  }
  0x88   : >> { %v314_v27 = vsub.f32 %v310_v25, %v313_v26  ;;  %s333_s28 = sshll.u32 (%p249_p7), %s742_s27, 4  ;;  %s334_s28 = int_to_ptr.vmem [resolvable:$true] %s333_s28 }
  0x89   : >> { %v304_v28 = vadd.f32 %v303_v24, %v287_v21 }
  0x8a   : >> { %v319_v29 = vsel %vm318_vm3, %v314_v27, 0.0 }
  0x8b   : >> { %v320_v30 = vmul.f32 %v319_v29, %v319_v29  ;;  %251 = sbr.rel (!%p249_p7) target bundleno = 119 (0x77), region = 98 }
  0x8d   : >> { %v321_v31 = vadd.f32 %v320_v30, %v304_v28  }
  0x8f   : >> { %v971_v3 = vmov %v321_v31  ;;  %v323_v33 = vadd.f32 (%p249_p7), %v322_v32, %v321_v31 }
  0x91   : > { %324 = vst [vmem:[#allocation7] sm:$0x3] %v323_v33 }
  0x92   : > { %486 = dma.vmem_to_hbm [thread:$0]  (%p489_p11), %s334_s28, 32, %s336_s17, [#allocation4]  }
  0x93   : > { %704 = dma.done.wait (%p489_p11), [#allocation4], 32  }
  0x94   : > { %706 = vsyncadd (%p489_p11), [#allocation4], 4294967264 }
  0x95 PF: > { %s19_s14 = sadd.s32 1, %s729_s14   ;;  %s972_s9 = smov %s713_s10 }
  0x96   : > { %p16_p12 = scmp.ge.s32.totalorder %s19_s14, 4   ;;  %s973_s10 = smov %s717_s11 }
  0x97   : > { %s974_s11 = smov %s808_s21  ;;  %s975_s12 = smov %s725_s13 }
  0x98   : > { %s976_s13 = smov %s978_s16  ;;  %18 = sbr.rel (!%p16_p12) target bundleno = 7 (0x7), region = 109 }
  0x9d   :  { %349 = vsyncpa [#allocation3], 1 }
  0x9e   :  { %351 = vsyncpa [#allocation3 + $0x1], 1 }
  0x9f   :  { %352 = vsyncpa [#allocation6], 1 }
  0xa0   :  { %354 = vsyncpa [#allocation6 + $0x1], 1 }
  0xa1   :  { %355 = vsyncpa [#allocation4], 1 }
  0xa2   :  { %357 = vsyncpa [#allocation4 + $0x1], 1 }

</bundles_post_ra>
